<compile_context>
chip_gen: v5e
topology: v5e:2x2
jax: 0.10.0
libtpu: 0.0.40
codegen_flags: <defaults>
</compile_context>

<pallas_src>
import jax
import jax.numpy as jnp
from jax.experimental import pallas as pl
from jax.experimental.pallas import tpu as pltpu


def _round_up(a: int, m: int) -> int:
    return ((a + m - 1) // m) * m


def _gelu_exact(x):
    # nn.GELU() default is the exact erf-based GELU (computed in f32).
    return 0.5 * x * (1.0 + jax.lax.erf(x * jnp.float32(0.7071067811865476)))


def _hw_params():
    """Per-generation (mxu_align, vmem_limit_bytes, row_tile_cap)."""
    kind = ""
    try:
        kind = jax.devices()[0].device_kind.lower()
    except Exception:
        pass
    if "v7" in kind:
        # 64 MiB VMEM per TensorCore, 2x256x256 MXU, 2 TCs/chip.
        return 256, 48 * 1024 * 1024, 256
    if "v6" in kind:
        # 128 MiB VMEM, 2x256x256 MXU.
        return 256, 100 * 1024 * 1024, 512
    if "v5" in kind or "v4" in kind:
        # 128 MiB VMEM, 128-wide MXU tiles are already full-width.
        return 128, 96 * 1024 * 1024, 512
    # Unknown chip: conservative defaults.
    return 128, 48 * 1024 * 1024, 256


# ----------------------------------------------------------------------------
# Kernels
# ----------------------------------------------------------------------------
def _mlp_kernel_resident(x_ref, w1_ref, b1_ref, w2_ref, b2_ref, o_ref):
    """1-D grid over row tiles; full hidden dim per step, weights VMEM-resident
    (constant index maps), no accumulator round trip."""
    h = jnp.dot(x_ref[...], w1_ref[...], preferred_element_type=jnp.float32)
    h = h + b1_ref[...].astype(jnp.float32)
    g = _gelu_exact(h)
    # Dropout with p=0.0 is the identity -> nothing to do.
    out = jnp.dot(g.astype(w2_ref.dtype), w2_ref[...],
                  preferred_element_type=jnp.float32)
    o_ref[...] = (out + b2_ref[...].astype(jnp.float32)).astype(o_ref.dtype)


def _mlp_kernel_tiled(x_ref, w1_ref, b1_ref, w2_ref, b2_ref, o_ref, acc_ref):
    """2-D grid = (row tiles [parallel], hidden tiles [arbitrary, reduction]).
    acc_ref: (tm, out_p) f32 VMEM accumulator, persists across hidden steps."""
    h_idx = pl.program_id(1)

    h = jnp.dot(x_ref[...], w1_ref[...], preferred_element_type=jnp.float32)
    h = h + b1_ref[...].astype(jnp.float32)
    g = _gelu_exact(h)
    contrib = jnp.dot(g.astype(w2_ref.dtype), w2_ref[...],
                      preferred_element_type=jnp.float32)

    @pl.when(h_idx == 0)
    def _first():
        acc_ref[...] = contrib          # direct assign: no zero-init round trip

    @pl.when(h_idx > 0)
    def _accum():
        acc_ref[...] += contrib

    @pl.when(h_idx == pl.num_programs(1) - 1)
    def _finalize():
        o_ref[...] = (acc_ref[...] + b2_ref[...].astype(jnp.float32)
                      ).astype(o_ref.dtype)


# ----------------------------------------------------------------------------
# Wrapper
# ----------------------------------------------------------------------------
def mlp_pallas(x, w1, b1, w2, b2, *, compute_dtype=jnp.bfloat16,
               force_hidden_tile=None):
    """Fused fc1 -> GELU -> (dropout p=0) -> fc2 -> (dropout p=0).

    x: (..., in_dim); w1: (in_dim, hidden); b1: (hidden,);
    w2: (hidden, out_dim); b2: (out_dim,).  Weights are stored transposed
    vs. PyTorch's nn.Linear so the kernel runs plain row-major MXU matmuls.
    MXU inputs are cast to `compute_dtype` (bf16 default); biases and
    accumulation stay f32.  `force_hidden_tile` forces the hidden-tiled
    (accumulator) path — used for testing.
    """
    in_dim = x.shape[-1]
    hidden, out_dim = w1.shape[1], w2.shape[1]
    lead = x.shape[:-1]
    xf = x.reshape(-1, in_dim)
    n = xf.shape[0]

    mxu_align, vmem_limit, tm_cap = _hw_params()
    csz = jnp.dtype(compute_dtype).itemsize
    osz = jnp.dtype(x.dtype).itemsize

    # Lane-dense, MXU-friendly padded feature dims.
    in_p = _round_up(in_dim, mxu_align)
    hid_p = _round_up(hidden, mxu_align)
    out_p = _round_up(out_dim, mxu_align)

    budget = int(vmem_limit * 0.85)   # headroom for pipeline bookkeeping

    def weight_bytes(th):
        # w1/w2 slabs (counted double-buffered, conservative) + f32 biases.
        return 2 * (in_p * th + th * out_p) * csz + 2 * (hid_p + out_p) * 4

    # Minimum row-tile footprint (tm = 8), used when sizing the hidden tile.
    min_rows = 2 * 8 * (in_p * csz + out_p * osz) + 8 * out_p * 4

    # --- hidden tile: prefer the full hidden dim (weights resident). ---------
    if force_hidden_tile is not None:
        th = int(force_hidden_tile)
        assert hid_p % th == 0, "force_hidden_tile must divide padded hidden"
    elif weight_bytes(hid_p) + min_rows <= budget:
        th = hid_p
    else:
        th = mxu_align
        for cand in range(hid_p - mxu_align, mxu_align - 1, -mxu_align):
            if hid_p % cand == 0 and weight_bytes(cand) + min_rows <= budget:
                th = cand
                break
    resident = (th == hid_p) and force_hidden_tile is None

    # --- row tile: as large as the remaining VMEM budget allows. -------------
    n8 = _round_up(max(n, 8), 8)
    per_row = 2 * (in_p * csz + out_p * osz) + (0 if resident else out_p * 4)
    rem = max(budget - weight_bytes(th), per_row * 8)
    tm = min(tm_cap, n8, max(8, (rem // per_row) // 8 * 8))
    # Keep >= 2 row tiles when possible so v7x can megacore-shard the row axis.
    if tm >= n8 and n8 > 8:
        tm = max(8, _round_up((n8 + 1) // 2, 8))
    n_p = _round_up(n, tm)
    n_rows = n_p // tm

    # Zero-pad (padded rows/cols contribute nothing; sliced away below) + cast.
    xf_p = jnp.pad(xf, ((0, n_p - n), (0, in_p - in_dim))).astype(compute_dtype)
    w1_p = jnp.pad(w1, ((0, in_p - in_dim), (0, hid_p - hidden))).astype(compute_dtype)
    w2_p = jnp.pad(w2, ((0, hid_p - hidden), (0, out_p - out_dim))).astype(compute_dtype)
    b1_p = jnp.pad(b1, (0, hid_p - hidden)).astype(jnp.float32).reshape(1, hid_p)
    b2_p = jnp.pad(b2, (0, out_p - out_dim)).astype(jnp.float32).reshape(1, out_p)

    if resident:
        grid = (n_rows,)
        kernel = _mlp_kernel_resident
        in_specs = [
            pl.BlockSpec((tm, in_p), lambda i: (i, 0)),
            pl.BlockSpec((in_p, hid_p), lambda i: (0, 0)),   # DMA'd once
            pl.BlockSpec((1, hid_p), lambda i: (0, 0)),
            pl.BlockSpec((hid_p, out_p), lambda i: (0, 0)),  # DMA'd once
            pl.BlockSpec((1, out_p), lambda i: (0, 0)),
        ]
        out_specs = pl.BlockSpec((tm, out_p), lambda i: (i, 0))
        scratch_shapes = []
        dim_sem = ("parallel",)
        weight_passes = 1
    else:
        grid = (n_rows, hid_p // th)   # reduction (hidden) axis last
        kernel = _mlp_kernel_tiled
        in_specs = [
            pl.BlockSpec((tm, in_p), lambda i, h: (i, 0)),
            pl.BlockSpec((in_p, th), lambda i, h: (0, h)),
            pl.BlockSpec((1, th), lambda i, h: (0, h)),
            pl.BlockSpec((th, out_p), lambda i, h: (h, 0)),
            pl.BlockSpec((1, out_p), lambda i, h: (0, 0)),
        ]
        out_specs = pl.BlockSpec((tm, out_p), lambda i, h: (i, 0))
        scratch_shapes = [pltpu.VMEM((tm, out_p), jnp.float32)]
        dim_sem = ("parallel", "arbitrary")
        weight_passes = n_rows   # weights re-streamed once per row tile

    cost = pl.CostEstimate(
        flops=2 * n_p * in_p * hid_p + 2 * n_p * hid_p * out_p,
        transcendentals=n_p * hid_p,
        bytes_accessed=(csz * n_p * in_p
                        + weight_passes * csz * (in_p * hid_p + hid_p * out_p)
                        + 4 * (hid_p + out_p)
                        + osz * n_p * out_p),
    )

    out = pl.pallas_call(
        kernel,
        out_shape=jax.ShapeDtypeStruct((n_p, out_p), x.dtype),
        grid_spec=pltpu.PrefetchScalarGridSpec(
            num_scalar_prefetch=0,
            grid=grid,
            in_specs=in_specs,
            out_specs=out_specs,
            scratch_shapes=scratch_shapes,
        ),
        compiler_params=pltpu.CompilerParams(
            dimension_semantics=dim_sem,
            vmem_limit_bytes=vmem_limit,
        ),
        cost_estimate=cost,
    )(xf_p, w1_p, b1_p, w2_p, b2_p)

    return out[:n, :out_dim].reshape(*lead, out_dim)


def mlp_reference(x, w1, b1, w2, b2):
    h = x @ w1 + b1
    h = 0.5 * h * (1.0 + jax.lax.erf(h * jnp.float32(0.7071067811865476)))
    return h @ w2 + b2


if __name__ == "__main__":
    # Small shapes: batch=2, seq=8, in_dim=32, hidden=64, out_dim=32
    # (intentionally not multiples of 128/256 so the padding path is exercised).
    B, S, in_dim, hidden, out_dim = 2, 8, 32, 64, 32
    key = jax.random.PRNGKey(0)
    kx, k1, k2, k3, k4 = jax.random.split(key, 5)

    x = jax.random.normal(kx, (B, S, in_dim), dtype=jnp.float32)
    s1 = 1.0 / (in_dim ** 0.5)
    s2 = 1.0 / (hidden ** 0.5)
    w1 = jax.random.uniform(k1, (in_dim, hidden), jnp.float32, -s1, s1)
    b1 = jax.random.uniform(k2, (hidden,), jnp.float32, -s1, s1)
    w2 = jax.random.uniform(k3, (hidden, out_dim), jnp.float32, -s2, s2)
    b2 = jax.random.uniform(k4, (out_dim,), jnp.float32, -s2, s2)

    y_ref = mlp_reference(x, w1, b1, w2, b2)

    # Fast path: bf16 MXU, weights VMEM-resident, 1-D parallel row grid.
    y_fast = mlp_pallas(x, w1, b1, w2, b2)
    jax.block_until_ready(y_fast)
    assert y_fast.shape == (B, S, out_dim)
    assert jnp.allclose(y_fast, y_ref, atol=3e-2, rtol=3e-2), "bf16 path mismatch"

    # Exact-parity path: f32 MXU, forced hidden tiling (exercises the
    # accumulator kernel and init/accumulate/finalize pl.when logic).
    y_exact = mlp_pallas(x, w1, b1, w2, b2, compute_dtype=jnp.float32,
                         force_hidden_tile=128)
    jax.block_until_ready(y_exact)
    assert jnp.allclose(y_exact, y_ref, atol=2e-5, rtol=2e-5), "f32 path mismatch"

    print("KERNEL_OK")
</pallas_src>

<mosaic_0001>
module attributes {stable_mosaic.version = 11 : i64} {
  func.func @_mlp_kernel_resident(%arg0: i32, %arg1: memref<8x128xbf16, #tpu.memory_space<vmem>>, %arg2: memref<128x128xbf16, #tpu.memory_space<vmem>>, %arg3: memref<1x128xf32, #tpu.memory_space<vmem>>, %arg4: memref<128x128xbf16, #tpu.memory_space<vmem>>, %arg5: memref<1x128xf32, #tpu.memory_space<vmem>>, %arg6: memref<8x128xf32, #tpu.memory_space<vmem>>) attributes {dimension_semantics = [#tpu.dimension_semantics<parallel>], iteration_bounds = array<i64: 2>, scalar_prefetch = 0 : i64, scratch_operands = 0 : i64, tpu.core_type = #tpu.core_type<tc>, window_params = [{transform_indices = @transform_0, window_bounds = array<i64: 8, 128>}, {pipeline_mode = #tpu.pipeline_mode<synchronous>, transform_indices = @transform_1, window_bounds = array<i64: 128, 128>}, {pipeline_mode = #tpu.pipeline_mode<synchronous>, transform_indices = @transform_2, window_bounds = array<i64: 1, 128>}, {pipeline_mode = #tpu.pipeline_mode<synchronous>, transform_indices = @transform_3, window_bounds = array<i64: 128, 128>}, {pipeline_mode = #tpu.pipeline_mode<synchronous>, transform_indices = @transform_4, window_bounds = array<i64: 1, 128>}, {transform_indices = @transform_5, window_bounds = array<i64: 8, 128>}]} {
    %c0 = arith.constant 0 : index
    %c0_0 = arith.constant 0 : index
    %0 = vector.load %arg1[%c0, %c0_0] : memref<8x128xbf16, #tpu.memory_space<vmem>>, vector<8x128xbf16>
    %c0_1 = arith.constant 0 : index
    %c0_2 = arith.constant 0 : index
    %1 = vector.load %arg2[%c0_1, %c0_2] : memref<128x128xbf16, #tpu.memory_space<vmem>>, vector<128x128xbf16>
    %cst = arith.constant dense<0.000000e+00> : vector<8x128xf32>
    %2 = tpu.matmul %0, %1, %cst {dimension_numbers = #tpu.dot_dimension_numbers<[1], [0], [0], [1], [0, 0, 1, 1], [], []>} : vector<8x128xbf16>, vector<128x128xbf16>, vector<8x128xf32> -> vector<8x128xf32>
    %c0_3 = arith.constant 0 : index
    %c0_4 = arith.constant 0 : index
    %3 = vector.load %arg3[%c0_3, %c0_4] : memref<1x128xf32, #tpu.memory_space<vmem>>, vector<1x128xf32>
    %4 = vector.broadcast %3 : vector<1x128xf32> to vector<8x128xf32>
    %5 = arith.addf %2, %4 : vector<8x128xf32>
    %cst_5 = arith.constant 5.000000e-01 : f32
    %6 = vector.broadcast %cst_5 : f32 to vector<8x128xf32>
    %7 = arith.mulf %6, %5 : vector<8x128xf32>
    %cst_6 = arith.constant 0.707106769 : f32
    %8 = vector.broadcast %cst_6 : f32 to vector<8x128xf32>
    %9 = arith.mulf %5, %8 : vector<8x128xf32>
    %10 = math.erf %9 : vector<8x128xf32>
    %cst_7 = arith.constant 1.000000e+00 : f32
    %11 = vector.broadcast %cst_7 : f32 to vector<8x128xf32>
    %12 = arith.addf %11, %10 : vector<8x128xf32>
    %13 = arith.mulf %7, %12 : vector<8x128xf32>
    %14 = arith.truncf %13 : vector<8x128xf32> to vector<8x128xbf16>
    %c0_8 = arith.constant 0 : index
    %c0_9 = arith.constant 0 : index
    %15 = vector.load %arg4[%c0_8, %c0_9] : memref<128x128xbf16, #tpu.memory_space<vmem>>, vector<128x128xbf16>
    %cst_10 = arith.constant dense<0.000000e+00> : vector<8x128xf32>
    %16 = tpu.matmul %14, %15, %cst_10 {dimension_numbers = #tpu.dot_dimension_numbers<[1], [0], [0], [1], [0, 0, 1, 1], [], []>} : vector<8x128xbf16>, vector<128x128xbf16>, vector<8x128xf32> -> vector<8x128xf32>
    %c0_11 = arith.constant 0 : index
    %c0_12 = arith.constant 0 : index
    %17 = vector.load %arg5[%c0_11, %c0_12] : memref<1x128xf32, #tpu.memory_space<vmem>>, vector<1x128xf32>
    %18 = vector.broadcast %17 : vector<1x128xf32> to vector<8x128xf32>
    %19 = arith.addf %16, %18 : vector<8x128xf32>
    %c0_13 = arith.constant 0 : index
    %c0_14 = arith.constant 0 : index
    %20 = vector.load %arg6[%c0_13, %c0_14] : memref<8x128xf32, #tpu.memory_space<vmem>>, vector<8x128xf32>
    tpu.vector_store %arg6[%c0_13, %c0_14], %19 {strides = array<i32>} : memref<8x128xf32, #tpu.memory_space<vmem>>, vector<8x128xf32>,
    return
  }
  func.func @transform_0(%arg0: i32) -> (i32, i32) {
    %c0_i32 = arith.constant 0 : i32
    %c0_i32_0 = arith.constant 0 : i32
    return %arg0, %c0_i32 : i32, i32
  }
  func.func @transform_1(%arg0: i32) -> (i32, i32) {
    %c0_i32 = arith.constant 0 : i32
    %c0_i32_0 = arith.constant 0 : i32
    %c0_i32_1 = arith.constant 0 : i32
    return %c0_i32, %c0_i32_0 : i32, i32
  }
  func.func @transform_2(%arg0: i32) -> (i32, i32) {
    %c0_i32 = arith.constant 0 : i32
    %c0_i32_0 = arith.constant 0 : i32
    %c0_i32_1 = arith.constant 0 : i32
    return %c0_i32, %c0_i32_0 : i32, i32
  }
  func.func @transform_3(%arg0: i32) -> (i32, i32) {
    %c0_i32 = arith.constant 0 : i32
    %c0_i32_0 = arith.constant 0 : i32
    %c0_i32_1 = arith.constant 0 : i32
    return %c0_i32, %c0_i32_0 : i32, i32
  }
  func.func @transform_4(%arg0: i32) -> (i32, i32) {
    %c0_i32 = arith.constant 0 : i32
    %c0_i32_0 = arith.constant 0 : i32
    %c0_i32_1 = arith.constant 0 : i32
    return %c0_i32, %c0_i32_0 : i32, i32
  }
  func.func @transform_5(%arg0: i32) -> (i32, i32) {
    %c0_i32 = arith.constant 0 : i32
    %c0_i32_0 = arith.constant 0 : i32
    return %arg0, %c0_i32 : i32, i32
  }
}

</mosaic_0001>

<bundles_post_ra>
// kernel: tpu_custom_call.1
= control target key start
LH: loop header
LB: loop body
LE: loop exit
PB: predicated region body
PF: predicated region fallthrough
CT: control target
= control target key end

     0   :  { %10 = vsyncpa [#allocation3], 0  ;;  %s1107_s0 = inlined_call_operand.hbm [shape: bf16[16,128], index: 0, kind: input, shape index: {}]   ;;  %s1108_s1 = inlined_call_operand.hbm [shape: bf16[128,128], index: 1, kind: input, shape index: {}]   ;;  %s1109_s2 = inlined_call_operand.vmem [shape: f32[1,128], index: 2, kind: input, shape index: {}]   ;;  %s1110_s3 = inlined_call_operand.hbm [shape: bf16[128,128], index: 3, kind: input, shape index: {}]   ;;  %s1111_s4 = inlined_call_operand.vmem [shape: f32[1,128], index: 4, kind: input, shape index: {}]   ;;  %s1112_s5 = inlined_call_operand.hbm [shape: f32[16,128], index: 5, kind: output, shape index: {}]  }
   0x1   :  { %12 = vsyncpa [#allocation3 + $0x1], 0 }
   0x2   :  { %13 = vsyncpa [#allocation6], 0 }
   0x3   :  { %14 = vsyncpa [#allocation4], 0 }
   0x4   :  { %16 = vsyncpa [#allocation4 + $0x1], 0  ;;  %s955_s18 = smov 0   ;;  %s957_s19 = smov 0  }
   0x5   :  { %s959_s20 = smov 0   ;;  %s961_s21 = smov 0  }
   0x6 LB: > { %s174_s24 = sshll.u32 %s1108_s1, 4  ;;  %s979_s25 = sadd.s32 4294967295, %s919_s21   ;;  %s919_s21 = sphi %s961_s21, %s1123_s21   ;;  %s915_s20 = sphi %s959_s20, %s1122_s20   ;;  %s911_s19 = sphi %s957_s19, %s1121_s19   ;;  %s907_s18 = sphi %s955_s18, %s1120_s18   ;;  %s175_s24 = int_to_ptr.hbm [resolvable:$true] %s174_s24 }
   0x7   : > { %p590_p0 = scmp.ge.s32.totalorder %s919_s21, 1  ;;  %p43_p1 = scmp.eq.s32.totalorder %s979_s25, 0 }
   0x8   : > { %p163_p2 = scmp.lt.s32.totalorder %s919_s21, 3  ;;  %s921_s27 = smov [#allocation5]  }
   0x9   : > { %s176_s28 = sshll.u32 %s921_s27, 4  ;;  %s191_s6 = sshll.u32 %s1110_s3, 4  ;;  %s177_s28 = int_to_ptr.vmem [resolvable:$true] %s176_s28  ;;  %s192_s6 = int_to_ptr.hbm [resolvable:$true] %s191_s6 }
   0xa   : > { %p984_p3 = pnand %p590_p0, %p163_p2  ;;  %s922_s7 = smov [#allocation7]  }
   0xb   : > { %s193_s8 = sshll.u32 %s922_s7, 4  ;;  %s923_s9 = smov 64   ;;  %s194_s8 = int_to_ptr.vmem [resolvable:$true] %s193_s8 }
   0xc   : > { %p698_p4 = pneg %p984_p3  ;;  %s924_s10 = smov 4  }
   0xd   : > { %s589_s11 = sadd.s32 4294967294, %s919_s21   ;;  %s998_s12 = sadd.s32 1, %s919_s21  }
   0xe   : > { %p699_p6 = pnand %p698_p4, %p43_p1  ;;  %s26_s13 = ssub.s32 %s919_s21, %s998_s12 }
   0xf   : > { %s29_s14 = sadd.s32 1, %s915_s20  ;;  %p27_p7 = scmp.eq.s32.totalorder %s26_s13, 0 }
  0x10   : > { %701 = dma.hbm_to_vmem [thread:$0]  (!%p699_p6), %s175_s24, 1024, %s177_s28, [#allocation6], %s923_s9, %s923_s9, %s924_s10  }
  0x11   : > { %704 = dma.hbm_to_vmem [thread:$0]  (!%p699_p6), %s192_s6, 1024, %s194_s8, [#allocation6], %s923_s9, %s923_s9, %s924_s10  }
  0x12   : > { %p36_p8 = scmp.ne.s32.totalorder %s915_s20, %s911_s19  ;;  %p37_p9 = scmp.eq.s32.totalorder %s919_s21, 0 }
  0x13   : > { %p42_p10 = scmp.ne.s32.totalorder %s911_s19, %s907_s18  ;;  %p150_p13 = scmp.eq.s32.totalorder %s979_s25, 1 }
  0x14   : > { %s1009_s15 = scalar_select %p27_p7, %s915_s20, %s29_s14  }
  0x15   : > { %p1011_p11 = por %p37_p9, %p36_p8  ;;  %p1017_p12 = por %p43_p1, %p42_p10 }
  0x16   : > { %p156_p0 = scmp.eq.s32.totalorder %s589_s11, 1  ;;  %p715_p2 = scmp.lt.s32.totalorder %s919_s21, 2 }
  0x17   : > { %s210_s22 = sand.u32 1, %s915_s20   ;;  %p1024_p4 = por %p150_p13, %p36_p8 }
  0x18   : > { %p1028_p6 = por %p156_p0, %p42_p10  ;;  %s594_s27 = sshll.u32 %s210_s22, 2 }
  0x19   : > { %s595_s28 = sshll.u32 %s919_s21, 2  ;;  %s214_s7 = scalar_lea.vmem [#allocation2], %s594_s27 }
  0x1a   : > { %s218_s6 = scalar_lea.hbm %s1107_s0, %s595_s28  ;;  %s222_s8 = sshll.u32 %s214_s7, 4  ;;  %s223_s8 = int_to_ptr.vmem [resolvable:$true] %s222_s8 }
  0x1b   : > { %s220_s9 = sshll.u32 %s218_s6, 4  ;;  %p1038_p7 = pnand %p715_p2, %p1011_p11  ;;  %s221_s9 = int_to_ptr.hbm [resolvable:$true] %s220_s9 }
  0x1c   : > { %s211_s11 = scalar_lea.sflag [#allocation3], %s210_s22  ;;  %s819_s13 = sshra.s32 %s221_s9, 4  ;;  %s820_s13 = int_to_ptr.hbm [resolvable:$true] %s819_s13 }
  0x1d   : > { %s821_s14 = scalar_lea.hbm %s820_s13, 4  ;;  %p823_p9 = pneg %p1038_p7 }
  0x1e   : > { %p822_p8 = scmp.ne.s32.totalorder %s820_s13, %s821_s14  ;;  %s826_s29 = scalar_lea.hbm %s1107_s0, 8 }
  0x1f   : > { %p827_p11 = scmp.lt.s32.totalorder %s820_s13, %s1107_s0  ;;  %p828_p0 = scmp.lt.s32.totalorder %s826_s29, %s821_s14 }
  0x20   : > { %p824_p10 = pnand %p823_p9, %p822_p8 }
  0x21   : > { %p829_p2 = por %p828_p0, %p827_p11 }
  0x22   : > { %p825_p13 = pneg %p824_p10 }
  0x24   : > { %p830_p5 = pnand %p829_p2, %p825_p13 }
  0x26   : > { %833 = shalt.err (!%p830_p5)
}
  0x27   : > { %708 = dma.hbm_to_vmem [thread:$0]  (!%p1038_p7), %s221_s9, 64, %s223_s8, %s211_s11  }
  0x28   : > { %231 = sbr.rel (%p984_p3) target bundleno = 395 (0x18b), region = 40  ;;  %s1055_s22 = sand.u32 (!%p984_p3), 1, %s911_s19  }
  0x29   : > { %s597_s6 = sshll.u32 (!%p984_p3), %s1055_s22, 2  ;;  %s234_s7 = scalar_lea.sflag (!%p984_p3), [#allocation3], %s1055_s22 }
  0x2a   : > { %s237_s27 = scalar_lea.vmem (!%p984_p3), [#allocation2], %s597_s6 }
  0x2d   : > { %894 = dma.done.wait (%p1017_p12), %s234_s7, 64  }
  0x2e   : > { %896 = vsyncadd (%p1017_p12), %s234_s7, 4294967232 }
  0x2f   : > { %898 = dma.done.wait (%p43_p1), [#allocation6], 2048  }
  0x30   : > { %900 = vsyncadd (%p43_p1), [#allocation6], 4294965248  ;;  %v677_v0 = vld [vmem:[#allocation5 + $0x38] sm:$0xff]  ;;  %v676_v1 = vld [vmem:[#allocation5 + $0x30] sm:$0xff]  ;;  %s667_s8 = sshll.u32 %s979_s25, 3  ;;  %s600_s9 = sshll.u32 %s1055_s22, 3 }
  0x31   : > { %344 = vmatpush.bf16.msra.mxu0 %v677_v0  ;;  %v675_v2 = vld [vmem:[#allocation5 + $0x28] sm:$0xff]  ;;  %v674_v3 = vld [vmem:[#allocation5 + $0x20] sm:$0xff]  ;;  %v673_v4 = vld [vmem:[#allocation5 + $0x18] sm:$0xff]  ;;  %s495_s13 = scalar_lea.hbm %s1112_s5, %s667_s8  ;;  %s274_s29 = scalar_lea.vmem [#allocation8], %s600_s9 }
  0x32   : > { %v672_v5 = vld [vmem:[#allocation5 + $0x10] sm:$0xff]  ;;  %v671_v6 = vld [vmem:[#allocation5 + $0x8] sm:$0xff]  ;;  %v670_v7 = vld [vmem:[#allocation5] sm:$0xff]  ;;  %s497_s30 = sshll.u32 %s274_s29, 4  ;;  %s499_s16 = sshll.u32 %s495_s13, 4  ;;  %s498_s30 = int_to_ptr.vmem [resolvable:$true] %s497_s30  ;;  %s500_s16 = int_to_ptr.hbm [resolvable:$true] %s499_s16 }
  0x33   : > { %v275_v8 = vld [vmem:[%s237_s27] sm:$0xf]  ;;  %v684_v10 = vld [vmem:[#allocation7 + $0x30] sm:$0xff]  ;;  %v683_v12 = vld [vmem:[#allocation7 + $0x28] sm:$0xff]  ;;  %s485_s6 = scalar_lea.sflag [#allocation4], %s1055_s22  ;;  %s863_s25 = sshra.s32 %s500_s16, 4  ;;  %s864_s25 = int_to_ptr.hbm [resolvable:$true] %s863_s25 }
  0x34   : > { %v685_v9 = vld [vmem:[#allocation7 + $0x38] sm:$0xff]  ;;  %v682_v15 = vld [vmem:[#allocation7 + $0x20] sm:$0xff]  ;;  %v680_v22 = vld [vmem:[#allocation7 + $0x10] sm:$0xff]  ;;  %s865_s7 = scalar_lea.hbm %s864_s25, 8  ;;  %s869_s17 = scalar_lea.hbm %s1112_s5, 16 }
  0x35   : > { %345 = vmatpush.bf16.msra.mxu0 %v676_v1  ;;  %470 = vmatpush.bf16.msra.mxu1 %v685_v9  ;;  %v755_v11 = vld [vmem:[%s1109_s2] ss:$0 sm:$0xff]  ;;  %v679_v27 = vld [vmem:[#allocation7 + $0x8] sm:$0xff]  ;;  %v678_v31 = vld [vmem:[#allocation7] sm:$0xff]  ;;  %p866_p1 = scmp.ne.s32.totalorder %s864_s25, %s865_s7  ;;  %p870_p12 = scmp.lt.s32.totalorder %s864_s25, %s1112_s5 }
  0x36   : > { %v681_v18 = vld [vmem:[#allocation7 + $0x18] sm:$0xff]  ;;  %p871_p7 = scmp.lt.s32.totalorder %s869_s17, %s865_s7 }
  0x37   : > { %v756_v61 = vld [vmem:[%s1111_s4] ss:$0 sm:$0xff]  ;;  %p867_p3 = pnand %p866_p1, %p1024_p4 }
  0x38   : > { %p872_p8 = por %p871_p7, %p870_p12 }
  0x39   : > { %346 = vmatpush.bf16.msra.mxu0 %v675_v2  ;;  %471 = vmatpush.bf16.msra.mxu1 %v684_v10  ;;  %p868_p5 = pneg %p867_p3 }
  0x3b   : > { %p873_p9 = pnand %p872_p8, %p868_p5 }
  0x3d   : > { %347 = vmatpush.bf16.msra.mxu0 %v674_v3  ;;  %472 = vmatpush.bf16.msra.mxu1 %v683_v12 }
  0x41   : > { %348 = vmatpush.bf16.msra.mxu0 %v673_v4  ;;  %473 = vmatpush.bf16.msra.mxu1 %v682_v15 }
  0x45   : > { %349 = vmatpush.bf16.msra.mxu0 %v672_v5  ;;  %474 = vmatpush.bf16.msra.mxu1 %v681_v18 }
  0x49   : > { %350 = vmatpush.bf16.msra.mxu0 %v671_v6  ;;  %475 = vmatpush.bf16.msra.mxu1 %v680_v22 }
  0x4d   : > { %351 = vmatpush.bf16.msra.mxu0 %v670_v7  ;;  %476 = vmatpush.bf16.msra.mxu1 %v679_v27 }
  0x50   : > { %352 = vmatmul.bf16.vlgmr.msra.gmra.mxu0 %v275_v8 }
  0x51   : > { %477 = vmatpush.bf16.msra.mxu1 %v678_v31 }
  0xcd   : > { %v353_v13 = vpop.f32.mrf.mxu0 }
  0xce   : > { %v354_v14 = vadd.f32 %v755_v11, %v353_v13 }
  0xd0   : > { %v358_v16 = vmul.f32 0.70710677, %v354_v14  ;;  %v357_v57 = vmul.f32 0.5, %v354_v14 }
  0xd2   : > { %v359_v17 = vmul.f32 %v358_v16, %v358_v16 }
  0xd4   : > { %v360_v19 = vmin.f32 %v359_v17, 16.0 }
  0xd5   : > { %v355_v20 = vpop.f32.mrf.mxu0 }
  0xd6   : > { %v361_v21 = vmul.f32 2.1237322e-06, %v360_v19  ;;  %v372_v23 = vmul.f32 3.8918573e-05, %v360_v19 }
  0xd8   : > { %v362_v24 = vadd.f32 0.00028619796, %v361_v21  ;;  %v373_v25 = vadd.f32 0.001143296, %v372_v23 }
  0xda   : > { %v363_v26 = vmul.f32 %v362_v24, %v360_v19  ;;  %v374_v28 = vmul.f32 %v373_v25, %v360_v19 }
  0xdc   : > { %v375_v29 = vadd.f32 0.014752088, %v374_v28  ;;  %v364_v30 = vadd.f32 0.0036580483, %v363_v26 }
  0xde   : > { %v376_v32 = vmul.f32 %v375_v29, %v360_v19  ;;  %v365_v34 = vmul.f32 %v364_v30, %v360_v19 }
  0xe0   : > { %v377_v33 = vadd.f32 0.112945676, %v376_v32  ;;  %v366_v37 = vadd.f32 0.05243302, %v365_v34 }
  0xe2   : > { %v378_v35 = vmul.f32 %v377_v33, %v360_v19  ;;  %v367_v40 = vmul.f32 %v366_v37, %v360_v19 }
  0xe4   : > { %v379_v36 = vadd.f32 0.4994258, %v378_v35  ;;  %v368_v41 = vadd.f32 0.18741608, %v367_v40 }
  0xe6   : > { %v380_v38 = vmul.f32 %v379_v36, %v360_v19  ;;  %v369_v43 = vmul.f32 %v368_v41, %v360_v19 }
  0xe8   : > { %v381_v39 = vadd.f32 1.0, %v380_v38  ;;  %v370_v47 = vadd.f32 1.1283791, %v369_v43 }
  0xea   : > { %757 = vrcp.f32 %v381_v39  ;;  %v393_v46 = vand.u32 2147483648, %v381_v39  ;;  %v391_v49 = vand.u32 2147483647, %v381_v39  ;;  %vm387_vm1 = vweird.f32 %v381_v39 }
  0xeb   : > { %v371_v52 = vmul.f32 %v370_v47, %v358_v16 }
  0xec   : > { %v394_v51 = vor.u32 1.1754944e-38, %v393_v46  ;;  %vm392_vm3 = vcmp.eq.f32.partialorder %v391_v49, 8.507059e+37 }
  0xf0   : > { %v758_v42 = vpop.eup %757 }
  0xf1   : > { %v383_v44 = vmul.f32 %v758_v42, %v381_v39  ;;  %vm388_vm0 = vweird.f32 %v758_v42 }
  0xf2   : > { %vm389_vm2 = vmor %vm387_vm1, %vm388_vm0 }
  0xf3   : > { %v384_v45 = vsub.f32 1.0, %v383_v44 }
  0xf5   : > { %v385_v48 = vmul.f32 %v758_v42, %v384_v45 }
  0xf7   : > { %v386_v50 = vadd.f32 %v758_v42, %v385_v48 }
  0xf9   : > { %v390_v53 = vsel %vm389_vm2, %v758_v42, %v386_v50 }
  0xfa   : > { %v395_v54 = vsel %vm392_vm3, %v394_v51, %v390_v53 }
  0xfb   : > { %v396_v55 = vmul.f32 %v395_v54, %v371_v52 }
  0xfd   : > { %v633_v56 = vclamps-f32 %v396_v55, 1.0 }
  0xff   : > { %v399_v58 = vadd.f32 1.0, %v633_v56 }
 0x101   : > { %v400_v59 = vmul.f32 %v399_v58, %v357_v57 }
 0x103   : > { %v401_v60 = vpack.c.bf16 %v400_v59, %v400_v59 }
 0x105   : > { %478 = vmatmul.bf16.vlgmr.msra.gmra.mxu1 %v401_v60 }
 0x182   : > { %v479_v62 = vpop.f32.mrf.mxu1 }
 0x183   : > { %v480_v63 = vadd.f32 %v756_v61, %v479_v62 }
 0x185   : > { %483 = vst [vmem:[%s274_s29] sm:$0xff] %v480_v63 }
 0x186   : > { %876 = shalt.err (!%p873_p9)
}
 0x187   : > { %696 = dma.vmem_to_hbm [thread:$0]  (%p1024_p4), %s498_s30, 128, %s500_s16, %s485_s6  }
 0x18a   : > { %v481_v0 = vpop.f32.mrf.mxu1 }
 0x18b PF: > { %s511_s22 = sand.u32 1, %s907_s18   ;;  %p1119_p10 = scmp.ge.s32.totalorder %s919_s21, 2 }
 0x18c   : > { %s512_s10 = scalar_lea.sflag [#allocation4], %s511_s22 }
 0x18d   : > { %p710_p13 = pnand %p1119_p10, %p1028_p6 }
 0x18f   : > { %p711_p11 = pneg %p710_p13 }
 0x191   : > { %902 = dma.done.wait (%p711_p11), %s512_s10, 128  }
 0x192   : > { %904 = vsyncadd (%p711_p11), %s512_s10, 4294967168  ;;  %p19_p0 = scmp.ge.s32.totalorder %s998_s12, 4   ;;  %s1120_s18 = smov %s911_s19 }
 0x193   : > { %s1121_s19 = smov %s915_s20  ;;  %s1122_s20 = smov %s1009_s15 }
 0x194   : > { %s1123_s21 = smov %s998_s12  ;;  %21 = sbr.rel (!%p19_p0) target bundleno = 6 (0x6), region = 93 }
 0x199   :  { %518 = vsyncpa [#allocation3], 1 }
 0x19a   :  { %520 = vsyncpa [#allocation3 + $0x1], 1 }
 0x19b   :  { %521 = vsyncpa [#allocation6], 1 }
 0x19c   :  { %522 = vsyncpa [#allocation4], 1 }
 0x19d   :  { %524 = vsyncpa [#allocation4 + $0x1], 1 }

</bundles_post_ra>
